<compile_context>
chip_gen: v7x
topology: tpu7x:2x2x1
jax: 0.10.0
libtpu: 0.0.40
codegen_flags: <defaults>
</compile_context>

<pallas_src>
import jax
import jax.numpy as jnp
from jax.experimental import pallas as pl
from jax.experimental.pallas import tpu as pltpu

EPS = float(jnp.finfo(jnp.float32).tiny)


def token_norm_kernel(x_ref, o_ref):
    # x_ref block: (B, block_t, C). The reduction dims (0, 2) live entirely
    # inside the block, so each grid step handles its tokens independently.
    b, _, _c = x_ref.shape
    n = b * _c  # elements reduced per token

    # ---- Pass 1: per-token mean -------------------------------------------
    # Batch axis first (VALU adds on (block_t, C) slabs), then one lane(C)
    # reduce on the partial (B x less XLU work than a fused (0,2) reduce).
    # Re-reading x_ref per slab keeps every live temporary <= (block_t, C).
    psum = x_ref[0].astype(jnp.float32)
    for i in range(1, b):
        psum = psum + x_ref[i].astype(jnp.float32)
    mean = jnp.sum(psum, axis=-1, keepdims=True) * (1.0 / n)          # (bt, 1)

    # ---- Pass 2: unbiased variance (Bessel, divisor n-1) -------------------
    # Two-pass form for numerical safety. n == 1 degenerates to 0/0 = NaN,
    # same as the PyTorch reference.
    d0 = x_ref[0].astype(jnp.float32) - mean
    sq = d0 * d0
    for i in range(1, b):
        di = x_ref[i].astype(jnp.float32) - mean
        sq = sq + di * di
    var = jnp.sum(sq, axis=-1, keepdims=True) / float(n - 1)          # (bt, 1)

    # Exact reciprocal on the tiny (block_t, 1) stats; the full-tile work
    # below is then a broadcast multiply instead of a full-tile divide.
    inv = pl.reciprocal(jnp.sqrt(var) + EPS)                          # (bt, 1)

    # ---- Pass 3: normalize + store, one batch slab at a time ----------------
    # Per-slab re-reads guarantee the centered value is never a full-tile
    # temporary (and cannot be CSE'd with pass 2 into one).
    for i in range(b):
        o_ref[i] = ((x_ref[i].astype(jnp.float32) - mean) * inv).astype(o_ref.dtype)


def _vmem_capacity_bytes():
    # Per-generation physical VMEM (v5e/v6e: 128 MiB, v7x: 64 MiB per TC).
    try:
        return int(pltpu.get_tpu_info().vmem_capacity_bytes)
    except Exception:
        return 64 << 20  # conservative: assume the smallest (v7x-sized) part


def _sublane(itemsize):
    return {4: 8, 2: 16, 1: 32}.get(itemsize, 8)


def _pick_block_t(B, T, C, itemsize, vmem_cap):
    """Token-tile size: sublane-aligned, VMEM-budget-driven, >= min_steps steps."""
    sub = _sublane(itemsize)
    bytes_per_token = max(1, B * C) * 4  # f32 compute footprint per token row
    target_block_bytes = min(16 << 20, max(2 << 20, vmem_cap // 10))  # ~6 MiB v7x, ~13 MiB v6e
    min_block_bytes = 1 << 20
    min_steps = 8 if vmem_cap <= (64 << 20) else 4  # keep both v7x TCs busy

    # Tiny problems: whole token axis in one step (block == full dim is always
    # layout-legal regardless of T).
    if T * bytes_per_token <= min_block_bytes:
        return T

    # Largest sublane-aligned tile under the budget.
    bt = max(sub, (target_block_bytes // bytes_per_token) // sub * sub)
    if bt >= T:
        return T

    # Prefer >= min_steps grid steps (steady-state pipelining + megacore),
    # but never shrink below ~1 MiB per block.
    while pl.cdiv(T, bt) < min_steps:
        nb = max(sub, (bt // 2) // sub * sub)
        if nb == bt or nb * bytes_per_token < min_block_bytes:
            break
        bt = nb

    # Best effort: even step count so v7x's two TensorCores split evenly.
    steps = pl.cdiv(T, bt)
    if steps > 1 and steps % 2 == 1:
        cand = pl.cdiv(pl.cdiv(T, steps + 1), sub) * sub
        if cand >= sub and pl.cdiv(T, cand) % 2 == 0:
            bt = cand
    return bt


def token_norm(x, block_t=None):
    """TokenNorm forward. x: (B, T, C); stats over (batch, channel) per token."""
    B, T, C = x.shape
    itemsize = jnp.dtype(x.dtype).itemsize
    vmem_cap = _vmem_capacity_bytes()
    sub = _sublane(itemsize)

    if block_t is None:
        block_t = _pick_block_t(B, T, C, itemsize, vmem_cap)
    elif block_t >= T:
        block_t = T
    else:
        block_t = max(sub, pl.cdiv(block_t, sub) * sub)  # keep (8,128) layout legal

    # TODO(synk): add a B-tiling fallback (second "arbitrary" grid axis
    # accumulating per-token sum/sumsq partials with pl.when init/finalize)
    # for shapes where even the minimum 8-token tile exceeds the VMEM budget
    # because B*C is huge.

    grid = (pl.cdiv(T, block_t),)

    # Double-buffered in + out tiles, the (block_t, C) f32 partials, plus
    # slack for Mosaic internal scratch; capped below physical VMEM.
    tile_bytes = B * block_t * C * itemsize
    partial_bytes = 2 * block_t * C * 4
    needed = 4 * tile_bytes + partial_bytes + (2 << 20)
    vmem_limit = int(min(max(needed, 32 << 20), vmem_cap - (8 << 20)))

    return pl.pallas_call(
        token_norm_kernel,
        out_shape=jax.ShapeDtypeStruct(x.shape, x.dtype),
        grid=grid,
        in_specs=[pl.BlockSpec((B, block_t, C), lambda i: (0, i, 0))],
        out_specs=pl.BlockSpec((B, block_t, C), lambda i: (0, i, 0)),
        compiler_params=pltpu.CompilerParams(
            dimension_semantics=("parallel",),
            vmem_limit_bytes=vmem_limit,
        ),
    )(x)


def token_norm_ref(x):
    xf = x.astype(jnp.float32)
    xc = xf - jnp.mean(xf, axis=(0, 2), keepdims=True)
    std = jnp.std(xf, axis=(0, 2), keepdims=True, ddof=1)
    return (xc / (std + EPS)).astype(x.dtype)


if __name__ == "__main__":
    key = jax.random.PRNGKey(0)
    B, T, C = 2, 8, 32  # small token tensor: (batch, seq, hidden)
    x = jax.random.normal(key, (B, T, C), dtype=jnp.float32)

    out = jax.block_until_ready(token_norm(x))

    ref = token_norm_ref(x)
    assert out.shape == x.shape and out.dtype == x.dtype
    assert jnp.allclose(out, ref, atol=1e-5, rtol=1e-5), "mismatch vs reference"

    print("KERNEL_OK")
</pallas_src>

<mosaic_0001>
module attributes {stable_mosaic.version = 11 : i64} {
  func.func @token_norm_kernel(%arg0: i32, %arg1: memref<2x8x32xf32, #tpu.memory_space<vmem>>, %arg2: memref<2x8x32xf32, #tpu.memory_space<vmem>>) attributes {dimension_semantics = [#tpu.dimension_semantics<parallel>], iteration_bounds = array<i64: 1>, scalar_prefetch = 0 : i64, scratch_operands = 0 : i64, tpu.core_type = #tpu.core_type<tc>, window_params = [{transform_indices = @transform_0, window_bounds = array<i64: 2, 8, 32>}, {transform_indices = @transform_1, window_bounds = array<i64: 2, 8, 32>}]} {
    %c0 = arith.constant 0 : index
    %c0_0 = arith.constant 0 : index
    %c0_1 = arith.constant 0 : index
    %0 = vector.load %arg1[%c0, %c0_0, %c0_1] : memref<2x8x32xf32, #tpu.memory_space<vmem>>, vector<1x8x32xf32>
    %1 = vector.shape_cast %0 : vector<1x8x32xf32> to vector<8x32xf32>
    %c1 = arith.constant 1 : index
    %c0_2 = arith.constant 0 : index
    %c0_3 = arith.constant 0 : index
    %2 = vector.load %arg1[%c1, %c0_2, %c0_3] : memref<2x8x32xf32, #tpu.memory_space<vmem>>, vector<1x8x32xf32>
    %3 = vector.shape_cast %2 : vector<1x8x32xf32> to vector<8x32xf32>
    %4 = arith.addf %1, %3 : vector<8x32xf32>
    %cst = arith.constant dense<0.000000e+00> : vector<8xf32>
    %5 = vector.multi_reduction <add>, %4, %cst [1] : vector<8x32xf32> to vector<8xf32>
    %6 = vector.shape_cast %5 : vector<8xf32> to vector<8x1xf32>
    %cst_4 = arith.constant 1.562500e-02 : f32
    %7 = vector.broadcast %cst_4 : f32 to vector<8x1xf32>
    %8 = arith.mulf %6, %7 : vector<8x1xf32>
    %c0_5 = arith.constant 0 : index
    %c0_6 = arith.constant 0 : index
    %c0_7 = arith.constant 0 : index
    %9 = vector.load %arg1[%c0_5, %c0_6, %c0_7] : memref<2x8x32xf32, #tpu.memory_space<vmem>>, vector<1x8x32xf32>
    %10 = vector.shape_cast %9 : vector<1x8x32xf32> to vector<8x32xf32>
    %11 = vector.broadcast %8 : vector<8x1xf32> to vector<8x32xf32>
    %12 = arith.subf %10, %11 : vector<8x32xf32>
    %13 = arith.mulf %12, %12 : vector<8x32xf32>
    %c1_8 = arith.constant 1 : index
    %c0_9 = arith.constant 0 : index
    %c0_10 = arith.constant 0 : index
    %14 = vector.load %arg1[%c1_8, %c0_9, %c0_10] : memref<2x8x32xf32, #tpu.memory_space<vmem>>, vector<1x8x32xf32>
    %15 = vector.shape_cast %14 : vector<1x8x32xf32> to vector<8x32xf32>
    %16 = vector.broadcast %8 : vector<8x1xf32> to vector<8x32xf32>
    %17 = arith.subf %15, %16 : vector<8x32xf32>
    %18 = arith.mulf %17, %17 : vector<8x32xf32>
    %19 = arith.addf %13, %18 : vector<8x32xf32>
    %cst_11 = arith.constant dense<0.000000e+00> : vector<8xf32>
    %20 = vector.multi_reduction <add>, %19, %cst_11 [1] : vector<8x32xf32> to vector<8xf32>
    %21 = vector.shape_cast %20 : vector<8xf32> to vector<8x1xf32>
    %cst_12 = arith.constant 6.300000e+01 : f32
    %22 = vector.broadcast %cst_12 : f32 to vector<8x1xf32>
    %23 = arith.divf %21, %22 : vector<8x1xf32>
    %24 = math.sqrt %23 : vector<8x1xf32>
    %cst_13 = arith.constant 1.17549435E-38 : f32
    %25 = vector.broadcast %cst_13 : f32 to vector<8x1xf32>
    %26 = arith.addf %24, %25 : vector<8x1xf32>
    %27 = tpu.reciprocal %26 : vector<8x1xf32> -> vector<8x1xf32>
    %c0_14 = arith.constant 0 : index
    %c0_15 = arith.constant 0 : index
    %c0_16 = arith.constant 0 : index
    %28 = vector.load %arg1[%c0_14, %c0_15, %c0_16] : memref<2x8x32xf32, #tpu.memory_space<vmem>>, vector<1x8x32xf32>
    %29 = vector.shape_cast %28 : vector<1x8x32xf32> to vector<8x32xf32>
    %30 = vector.broadcast %8 : vector<8x1xf32> to vector<8x32xf32>
    %31 = arith.subf %29, %30 : vector<8x32xf32>
    %32 = vector.broadcast %27 : vector<8x1xf32> to vector<8x32xf32>
    %33 = arith.mulf %31, %32 : vector<8x32xf32>
    %c0_17 = arith.constant 0 : index
    %c0_18 = arith.constant 0 : index
    %c0_19 = arith.constant 0 : index
    %34 = vector.load %arg2[%c0_17, %c0_18, %c0_19] : memref<2x8x32xf32, #tpu.memory_space<vmem>>, vector<1x8x32xf32>
    %35 = vector.shape_cast %34 : vector<1x8x32xf32> to vector<8x32xf32>
    %36 = vector.shape_cast %33 : vector<8x32xf32> to vector<1x8x32xf32>
    tpu.vector_store %arg2[%c0_17, %c0_18, %c0_19], %36 {strides = array<i32>} : memref<2x8x32xf32, #tpu.memory_space<vmem>>, vector<1x8x32xf32>,
    %c1_20 = arith.constant 1 : index
    %c0_21 = arith.constant 0 : index
    %c0_22 = arith.constant 0 : index
    %37 = vector.load %arg1[%c1_20, %c0_21, %c0_22] : memref<2x8x32xf32, #tpu.memory_space<vmem>>, vector<1x8x32xf32>
    %38 = vector.shape_cast %37 : vector<1x8x32xf32> to vector<8x32xf32>
    %39 = vector.broadcast %8 : vector<8x1xf32> to vector<8x32xf32>
    %40 = arith.subf %38, %39 : vector<8x32xf32>
    %41 = vector.broadcast %27 : vector<8x1xf32> to vector<8x32xf32>
    %42 = arith.mulf %40, %41 : vector<8x32xf32>
    %c1_23 = arith.constant 1 : index
    %c0_24 = arith.constant 0 : index
    %c0_25 = arith.constant 0 : index
    %43 = vector.load %arg2[%c1_23, %c0_24, %c0_25] : memref<2x8x32xf32, #tpu.memory_space<vmem>>, vector<1x8x32xf32>
    %44 = vector.shape_cast %43 : vector<1x8x32xf32> to vector<8x32xf32>
    %45 = vector.shape_cast %42 : vector<8x32xf32> to vector<1x8x32xf32>
    tpu.vector_store %arg2[%c1_23, %c0_24, %c0_25], %45 {strides = array<i32>} : memref<2x8x32xf32, #tpu.memory_space<vmem>>, vector<1x8x32xf32>,
    return
  }
  func.func @transform_0(%arg0: i32) -> (i32, i32, i32) {
    %c0_i32 = arith.constant 0 : i32
    %c0_i32_0 = arith.constant 0 : i32
    %c0_i32_1 = arith.constant 0 : i32
    return %c0_i32, %arg0, %c0_i32_0 : i32, i32, i32
  }
  func.func @transform_1(%arg0: i32) -> (i32, i32, i32) {
    %c0_i32 = arith.constant 0 : i32
    %c0_i32_0 = arith.constant 0 : i32
    %c0_i32_1 = arith.constant 0 : i32
    return %c0_i32, %arg0, %c0_i32_0 : i32, i32, i32
  }
}

</mosaic_0001>

<bundles_post_ra>
// kernel: tpu_custom_call.1
= control target key start
LH: loop header
LB: loop body
LE: loop exit
PB: predicated region body
PF: predicated region fallthrough
CT: control target
= control target key end

     0   :  { %6 = vsyncpa [#allocation3], 0  ;;  %s179_s0 = inlined_call_operand.hbm [shape: f32[2,8,32], index: 0, kind: input, shape index: {}]   ;;  %s180_s1 = inlined_call_operand.hbm [shape: f32[2,8,32], index: 1, kind: output, shape index: {}]  }
   0x1   :  { %7 = vsyncpa [#allocation4], 0  ;;  %s131_s6 = smov [#allocation2]   ;;  %s83_s10 = scalar_lea.hbm %s179_s0, 256 }
   0x2   :  { %s13_s7 = sshll.u32 %s131_s6, 4  ;;  %p84_p0 = scmp.ne.s32.totalorder %s179_s0, %s83_s10  ;;  %s14_s7 = int_to_ptr.vmem [resolvable:$true] %s13_s7 }
   0x3   :  { %p87_p1 = scmp.lt.u32.totalorder %s83_s10, %s179_s0 }
   0x5   :  { %p89_p2 = pnand %p87_p1, %p84_p0 }
   0x7   :  { %92 = shalt.err (!%p89_p2)
}
   0x8   :  { %s93_s15 = scalar_lea.vmem %s14_s7, 256  ;;  %p98_p4 = scmp.lt.s32.totalorder %s14_s7, %s14_s7 }
   0x9   :  { %p94_p3 = scmp.ne.s32.totalorder %s14_s7, %s93_s15  ;;  %p99_p5 = scmp.lt.s32.totalorder %s93_s15, %s93_s15 }
   0xb   :  { %p100_p6 = por %p99_p5, %p98_p4 }
   0xd   :  { %p101_p7 = pnand %p100_p6, %p94_p3 }
   0xf   :  { %104 = shalt.err (!%p101_p7)
}
  0x10   :  { %s132_s16 = smov 128   ;;  %s133_s17 = smov 8  }
  0x11   :  { %19 = dma.hbm_to_vmem [thread:$0]  %s179_s0, 256, %s14_s7, [#allocation3], %s132_s16, %s132_s16, %s133_s17  }
  0x12   :  { %127 = dma.done.wait [#allocation3], 256  }
  0x13   :  { %128 = vsyncadd [#allocation3], 4294967040  ;;  %v23_v0 = vld [vmem:[#allocation2] sm:$0xff]  ;;  %v25_v1 = vld [vmem:[#allocation2 + $0x8] sm:$0xff]  ;;  %vm27_vm0 = vcmask 261120   ;;  %s134_s0 = smov [#allocation5]  }
  0x14   :  { %v26_v2 = vadd.f32 %v25_v1, %v23_v0  ;;  %s63_s20 = sshll.u32 %s134_s0, 4  ;;  %s64_s20 = int_to_ptr.vmem [resolvable:$true] %s63_s20 }
  0x15   :  { %s105_s21 = scalar_lea.vmem %s64_s20, 256  ;;  %p110_p9 = scmp.lt.s32.totalorder %s64_s20, %s64_s20 }
  0x16   :  { %v28_v3 = vsel %vm27_vm0, %v26_v2, 0.0  ;;  %p106_p8 = scmp.ne.s32.totalorder %s64_s20, %s105_s21  ;;  %p111_p10 = scmp.lt.s32.totalorder %s105_s21, %s105_s21 }
  0x17   :  { %29 = vadd.xlane.f32.xlu0 %v28_v3 }
  0x18   :  { %p112_p11 = por %p111_p10, %p110_p9 }
  0x1a   :  { %p113_p12 = pnand %p112_p11, %p106_p8 }
  0xa4   :  { %v30_v4 = vpop.xlane.xlu0 %29 }
  0xa5   :  { %v31_v5 = vmul.f32 0.015625, %v30_v4 }
  0xa7   :  { %v32_v6 = vsub.f32 %v23_v0, %v31_v5  ;;  %v54_v7 = vsub.f32 %v25_v1, %v31_v5 }
  0xa9   :  { %v33_v8 = vmul.f32 %v32_v6, %v32_v6  ;;  %v35_v9 = vmul.f32 %v54_v7, %v54_v7 }
  0xab   :  { %v36_v10 = vadd.f32 %v35_v9, %v33_v8 }
  0xad   :  { %v37_v11 = vsel %vm27_vm0, %v36_v10, 0.0 }
  0xae   :  { %38 = vadd.xlane.f32.xlu0 %v37_v11 }
 0x13b   :  { %v39_v12 = vpop.xlane.xlu0 %38 }
 0x13c   :  { %v41_v13 = vmul.f32 0.015873017, %v39_v12 }
 0x13e   :  { %79 = vrsqrt.f32 %v41_v13  ;;  %vm44_vm1 = vcmp.eq.f32.partialorder %v41_v13, inf  ;;  %v47_v16 = vand.u32 2147483648, %v41_v13  ;;  %vm46_vm2 = vcmp.eq.f32.partialorder %v41_v13, 0.0 }
 0x148   :  { %v80_v14 = vpop.eup %79 }
 0x149   :  { %v43_v15 = vmul.f32 %v80_v14, %v41_v13 }
 0x14b   :  { %v45_v17 = vsel %vm44_vm1, %v41_v13, %v43_v15 }
 0x14c   :  { %v48_v18 = vsel %vm46_vm2, %v47_v16, %v45_v17 }
 0x14d   :  { %v49_v19 = vadd.f32 1.1754944e-38, %v48_v18 }
 0x14f   :  { %81 = vrcp.f32 %v49_v19 }
 0x159   :  { %v82_v20 = vpop.eup %81 }
 0x15a   :  { %v51_v21 = vmul.f32 %v82_v20, %v32_v6  ;;  %v55_v22 = vmul.f32 %v82_v20, %v54_v7 }
 0x15c   :  { %52 = vst.msk [vmem:[#allocation5] sm:$0xff] %vm27_vm0, %v51_v21  ;;  %57 = vst.msk [vmem:[#allocation5 + $0x8] sm:$0xff] %vm27_vm0, %v55_v22 }
 0x15d   :  { %116 = shalt.err (!%p113_p12)
}
 0x15e   :  { %s117_s24 = scalar_lea.hbm %s180_s1, 256 }
 0x15f   :  { %p118_p13 = scmp.ne.s32.totalorder %s180_s1, %s117_s24  ;;  %p121_p0 = scmp.lt.u32.totalorder %s117_s24, %s180_s1 }
 0x161   :  { %p123_p1 = pnand %p121_p0, %p118_p13 }
 0x163   :  { %126 = shalt.err (!%p123_p1)
}
 0x164   :  { %69 = dma.vmem_to_hbm [thread:$0]  %s64_s20, 256, %s180_s1, [#allocation4], %s132_s16, %s132_s16, %s133_s17  }
 0x165   :  { %129 = dma.done.wait [#allocation4], 256  }
 0x166   :  { %130 = vsyncadd [#allocation4], 4294967040 }
 0x167   :  { %73 = vsyncpa [#allocation3], 1 }
 0x168   :  { %74 = vsyncpa [#allocation4], 1 }

</bundles_post_ra>
